<compile_context>
chip_gen: v7x
topology: tpu7x:2x2x1
jax: 0.10.0
libtpu: 0.0.40
codegen_flags: <defaults>
</compile_context>

<pallas_src>
import functools

import jax
import jax.numpy as jnp
from jax import lax
from jax.experimental import pallas as pl
from jax.experimental.pallas import tpu as pltpu


# ---------------------------------------------------------------------------
# generation-aware configuration & helpers
# ---------------------------------------------------------------------------
def _round_up(x, m):
    return ((x + m - 1) // m) * m


def _tpu_config():
    """Per-generation knobs: v5e/v6e have 128 MiB VMEM per core, v7x has 64 MiB."""
    try:
        vmem_cap = int(pltpu.get_tpu_info().vmem_capacity_bytes)
    except Exception:
        vmem_cap = 64 * 1024 * 1024                  # conservative (v7x-sized VMEM)
    try:
        kind = jax.devices()[0].device_kind.lower()
    except Exception:
        kind = ""
    big_vmem = vmem_cap >= 100 * 1024 * 1024         # v5e / v6e class parts
    return dict(
        vmem_limit_bytes=(80 if big_vmem else 32) * 1024 * 1024,
        # per-step budget for x multi-buffers + live f32 intermediates
        step_budget_bytes=(48 if big_vmem else 24) * 1024 * 1024,
        x_buffers=3 if big_vmem else 2,              # deeper x pipelining on 128-MiB parts
        # v5e's 128-deep MXU is half-filled already at C=32; v6e/v7x are 256-deep.
        mxu_min_channels=32 if "v5" in kind else 64,
    )


def _pick_b_tile(b):
    """Largest batch tile <= 8 that still leaves >= 2 blocks on the leading
    'parallel' grid axis whenever B >= 2 (v7x shards it across its 2 TCs)."""
    if b <= 1:
        return 1
    target = min(8, b // 2)
    for t in range(target, 0, -1):
        if b % t == 0:
            return t
    return 1


def _pick_hw_tile(hw, per_col_bytes, budget_bytes, extra_cap=None):
    """Largest 128-multiple spatial tile whose per-step footprint
    (x multi-buffers + live intermediates) fits `budget_bytes`; capped so the
    spatial grid keeps >= 2 steps when possible (double-buffered x DMA)."""
    hw_ceil = _round_up(hw, 128)
    t = (budget_bytes // max(per_col_bytes, 1)) // 128 * 128
    if extra_cap is not None:
        t = min(t, max(128, extra_cap // 128 * 128))
    t = max(128, min(t, hw_ceil))
    if hw_ceil >= 256:
        t = min(t, max(128, (hw_ceil // 2) // 128 * 128))
    return t


# ---------------------------------------------------------------------------
# kernel bodies
# ---------------------------------------------------------------------------
def _conv_gap_fc_vpu_kernel(x_ref, wcf_ref, bcc_ref, wfc_ref, bfc_ref,
                            o_ref, acc_ref, *, inv_hw, hw_total):
    """Small-C path: 1x1 conv as an unrolled broadcast-FMA on the VPU (f32).

    x_ref  : (B_t, C, HW_t)   input tile, channels-first (spatial on lanes)
    wcf_ref: (C, F, 1)        conv weight; per-c read is a sublane slab
                              (no per-step lane gather of a (F, C) column)
    bcc_ref: (F, 1)           conv bias (column)
    wfc_ref: (F, O_pad)       classifier weight (lane-dense, zero padded)
    bfc_ref: (1, O_pad)       classifier bias
    o_ref  : (B_t, 1, O_pad)  logits (lane-dense)
    acc_ref: (B_t, F) f32     running spatial sum of relu(conv)  -- scratch
    """
    k = pl.program_id(1)

    @pl.when(k == 0)
    def _init():
        acc_ref[...] = jnp.zeros_like(acc_ref)

    x = x_ref[...]                        # (B_t, C, HW_t) f32
    b_t, c_dim, hw_t = x.shape
    wcf = wcf_ref[...]                    # (C, F, 1), read once; static slices below

    # 1x1 conv as an unrolled broadcast-FMA over the tiny channel dim (VPU);
    # hw_t is capped outside so this live f32 temp stays ~within the vreg file.
    h = jnp.zeros((b_t, wcf.shape[1], hw_t), jnp.float32)
    for c in range(c_dim):                # static unroll; c_dim is small here
        h = h + wcf[c][None, :, :] * x[:, c, :][:, None, :]
    h = jnp.maximum(h + bcc_ref[...][None, :, :], 0.0)

    if hw_total % hw_t != 0:              # ragged HW: mask the padded lanes
        lane = lax.broadcasted_iota(jnp.int32, h.shape, 2)
        h = jnp.where(k * hw_t + lane < hw_total, h, 0.0)

    # Partial global-average-pool: spatial (lane) sum for this tile (XLU).
    acc_ref[...] += jnp.sum(h, axis=-1)

    @pl.when(k == pl.num_programs(1) - 1)
    def _finalize():
        pooled = acc_ref[...] * inv_hw    # compile-time 1/HW constant, no divide
        out = jnp.dot(pooled, wfc_ref[...],
                      preferred_element_type=jnp.float32) + bfc_ref[...]
        o_ref[...] = out[:, None, :].astype(o_ref.dtype)


def _conv_gap_fc_mxu_kernel(x_ref, wc_ref, bc_ref, wfc_ref, bfc_ref,
                            o_ref, acc_ref, *, inv_hw, hw_total):
    """Large-C path: 1x1 conv as per-batch MXU matmuls contracting the C
    (sublane) dim of the channels-first tile -- no NCHW->NHWC transpose at all.

    x_ref  : (B_t, C, HW_t)   input tile (bf16), channels-first
    wc_ref : (C, F_pad)       conv weight (bf16, features zero-padded to 128)
    bc_ref : (1, F_pad) f32
    wfc_ref: (F_pad, O_pad) f32
    bfc_ref: (1, O_pad) f32
    o_ref  : (B_t, 1, O_pad)
    acc_ref: (B_t, F_pad) f32 running spatial sum of relu(conv)  -- scratch
    """
    k = pl.program_id(1)

    @pl.when(k == 0)
    def _init():
        acc_ref[...] = jnp.zeros_like(acc_ref)

    x = x_ref[...]                        # (B_t, C, HW_t)
    b_t, _, hw_t = x.shape
    w = wc_ref[...]                       # (C, F_pad)
    bias = bc_ref[...]                    # (1, F_pad)

    parts = []
    for b in range(b_t):                  # static unroll; extra MXU pushes are free
        # (C, HW_t)^T @ (C, F_pad) -> (HW_t, F_pad), f32 accumulation on the MXU.
        h = lax.dot_general(x[b], w, (((0,), (0,)), ((), ())),
                            preferred_element_type=jnp.float32)
        h = jnp.maximum(h + bias, 0.0)
        if hw_total % hw_t != 0:          # ragged HW: mask the padded rows
            row = lax.broadcasted_iota(jnp.int32, h.shape, 0)
            h = jnp.where(k * hw_t + row < hw_total, h, 0.0)
        parts.append(jnp.sum(h, axis=0, keepdims=True))      # (1, F_pad)
    acc_ref[...] += jnp.concatenate(parts, axis=0)

    @pl.when(k == pl.num_programs(1) - 1)
    def _finalize():
        pooled = acc_ref[...] * inv_hw
        out = jnp.dot(pooled, wfc_ref[...],
                      preferred_element_type=jnp.float32) + bfc_ref[...]
        o_ref[...] = out[:, None, :].astype(o_ref.dtype)


# ---------------------------------------------------------------------------
# host-side wrappers
# ---------------------------------------------------------------------------
def pretrained_model_forward(x_nchw, wc, bc, wfc, bfc,
                             mxu_input_dtype=jnp.bfloat16):
    """Synthetic pretrained model: 1x1 conv -> ReLU -> global-avg-pool -> Linear.

    x_nchw: (B, C, H, W) f32 (PyTorch NCHW layout)
    wc    : (C, F)   conv1x1 weight (transposed vs torch (F, C, 1, 1))
    bc    : (1, F)   conv bias
    wfc   : (F, O)   Linear weight (transposed vs torch (O, F))
    bfc   : (1, O)   Linear bias
    returns (B, O) logits.
    """
    B, C, H, W = x_nchw.shape
    F = wc.shape[1]
    O = wfc.shape[1]
    HW = H * W
    inv_hw = 1.0 / float(HW)

    cfg = _tpu_config()
    b_t = _pick_b_tile(B)
    o_pad = _round_up(O, 128)            # lane-dense output -> unmasked stores
    bfc_p = jnp.zeros((1, o_pad), jnp.float32).at[:, :O].set(bfc)

    # NCHW -> (B, C, HW) is a free reshape; both paths consume channels-first,
    # so no transpose pass over x ever touches HBM.
    x = x_nchw.reshape(B, C, HW)

    compiler_params = pltpu.CompilerParams(
        dimension_semantics=("parallel", "arbitrary"),
        vmem_limit_bytes=cfg["vmem_limit_bytes"])

    cost = pl.CostEstimate(
        flops=2 * B * HW * C * F + 2 * B * F * O,
        transcendentals=0,
        bytes_accessed=int(x_nchw.size * x_nchw.dtype.itemsize
                           + 4 * (wc.size + bc.size + wfc.size + bfc.size + B * O)))

    def _x_spec(c_dim, hw_t, n_k):
        bs = (b_t, c_dim, hw_t)
        imap = lambda b, k: (b, 0, k)
        # 3-deep buffering of the only per-k-varying input on 128-MiB VMEM parts.
        if cfg["x_buffers"] > 2 and n_k >= 3 and hasattr(pl, "Buffered"):
            return pl.BlockSpec(bs, imap, pipeline_mode=pl.Buffered(cfg["x_buffers"]))
        return pl.BlockSpec(bs, imap)

    if C < cfg["mxu_min_channels"]:
        # ---- VPU path: channels-first f32 broadcast-FMA (K=C would starve MXU). ----
        x_in = x.astype(jnp.float32)
        # Cap hw_t so the (B_t, F, HW_t) f32 temp stays ~within half the vreg file
        # (no VMEM spill of the conv intermediate), on top of the VMEM budget.
        vreg_cap = (128 * 1024) // (4 * b_t * max(F, 1))
        per_col = b_t * (cfg["x_buffers"] * C * 4 + F * 4)
        hw_t = _pick_hw_tile(HW, per_col, cfg["step_budget_bytes"], extra_cap=vreg_cap)
        n_k = pl.cdiv(HW, hw_t)
        grid = (B // b_t, n_k)

        wcf = wc.astype(jnp.float32).reshape(C, F, 1)   # per-c sublane slab layout
        bcc = bc.astype(jnp.float32).reshape(F, 1)
        wfc_p = jnp.zeros((F, o_pad), jnp.float32).at[:, :O].set(wfc)

        kernel = functools.partial(_conv_gap_fc_vpu_kernel,
                                   inv_hw=inv_hw, hw_total=HW)
        out_pad = pl.pallas_call(
            kernel,
            out_shape=jax.ShapeDtypeStruct((B, 1, o_pad), jnp.float32),
            grid_spec=pltpu.PrefetchScalarGridSpec(
                num_scalar_prefetch=0,
                grid=grid,
                in_specs=[
                    _x_spec(C, hw_t, n_k),
                    pl.BlockSpec((C, F, 1), lambda b, k: (0, 0, 0)),
                    pl.BlockSpec((F, 1), lambda b, k: (0, 0)),
                    pl.BlockSpec((F, o_pad), lambda b, k: (0, 0)),
                    pl.BlockSpec((1, o_pad), lambda b, k: (0, 0)),
                ],
                out_specs=pl.BlockSpec((b_t, 1, o_pad), lambda b, k: (b, 0, 0)),
                scratch_shapes=[pltpu.VMEM((b_t, F), jnp.float32)],
            ),
            compiler_params=compiler_params,
            cost_estimate=cost,
        )(x_in, wcf, bcc, wfc_p, bfc_p)
    else:
        # ---- MXU path: channels-first, per-batch matmul contracting C in-kernel. ----
        f_pad = _round_up(F, 128)        # lane-dense conv features / aligned K
        x_dtype = jnp.dtype(mxu_input_dtype)
        # bf16 halves the x DMA bytes (f32 MXU accumulate keeps accuracy).  In
        # production the producer would emit bf16 directly / fuse this convert.
        x_in = x.astype(x_dtype)
        wc_p = jnp.zeros((C, f_pad), x_dtype).at[:, :F].set(wc.astype(x_dtype))
        bc_p = jnp.zeros((1, f_pad), jnp.float32).at[:, :F].set(bc)
        wfc_pp = jnp.zeros((f_pad, o_pad), jnp.float32).at[:F, :O].set(wfc)

        # Per-step VMEM: x multi-buffers + per-batch f32 (HW_t, F_pad) matmul slab.
        per_col = b_t * (cfg["x_buffers"] * C * x_dtype.itemsize + f_pad * 4)
        hw_t = _pick_hw_tile(HW, per_col, cfg["step_budget_bytes"])
        n_k = pl.cdiv(HW, hw_t)
        grid = (B // b_t, n_k)

        kernel = functools.partial(_conv_gap_fc_mxu_kernel,
                                   inv_hw=inv_hw, hw_total=HW)
        out_pad = pl.pallas_call(
            kernel,
            out_shape=jax.ShapeDtypeStruct((B, 1, o_pad), jnp.float32),
            grid_spec=pltpu.PrefetchScalarGridSpec(
                num_scalar_prefetch=0,
                grid=grid,
                in_specs=[
                    _x_spec(C, hw_t, n_k),
                    pl.BlockSpec((C, f_pad), lambda b, k: (0, 0)),
                    pl.BlockSpec((1, f_pad), lambda b, k: (0, 0)),
                    pl.BlockSpec((f_pad, o_pad), lambda b, k: (0, 0)),
                    pl.BlockSpec((1, o_pad), lambda b, k: (0, 0)),
                ],
                out_specs=pl.BlockSpec((b_t, 1, o_pad), lambda b, k: (b, 0, 0)),
                scratch_shapes=[pltpu.VMEM((b_t, f_pad), jnp.float32)],
            ),
            compiler_params=compiler_params,
            cost_estimate=cost,
        )(x_in, wc_p, bc_p, wfc_pp, bfc_p)

    return out_pad[:, 0, :O]             # drop lane padding (keeps .view semantics)


def pretrained_classifier_forward(inputs, wc, bc, wfc, bfc):
    """PretrainedClassifier.forward: inputs[0] -> model(...) -> outputs[None, ...]."""
    x = inputs[0]
    outputs = pretrained_model_forward(x, wc, bc, wfc, bfc)
    # TODO(synk): self.model.plotBatches(...) debug-figure dumping (matplotlib /
    # file I/O, gated on debug_fig_dir) has no Pallas/TPU equivalent.
    return outputs[None, ...]


# ---------------------------------------------------------------------------
# pure-JAX reference (mirrors the PyTorch semantics)
# ---------------------------------------------------------------------------
def _reference_forward(inputs, wc, bc, wfc, bfc):
    x = inputs[0]                                            # (B, C, H, W)
    y = jnp.einsum("bchw,cf->bfhw", x, wc,
                   precision=lax.Precision.HIGHEST) + bc[0][None, :, None, None]
    y = jnp.maximum(y, 0.0)
    feats = jnp.mean(y, axis=(2, 3))                         # global avg pool
    out = jnp.dot(feats, wfc, precision=lax.Precision.HIGHEST) + bfc[0][None, :]
    return out[None, ...]


if __name__ == "__main__":
    key = jax.random.PRNGKey(0)

    def run_case(case_key, B, C, H, W, F, num_classes, atol, rtol):
        k_x, k_wc, k_bc, k_wfc, k_bfc = jax.random.split(case_key, 5)
        x = jax.random.normal(k_x, (B, C, H, W), dtype=jnp.float32)
        wc = jax.random.normal(k_wc, (C, F), dtype=jnp.float32) * 0.1
        bc = jax.random.normal(k_bc, (1, F), dtype=jnp.float32) * 0.1
        wfc = jax.random.normal(k_wfc, (F, num_classes), dtype=jnp.float32) * 0.1
        bfc = jax.random.normal(k_bfc, (1, num_classes), dtype=jnp.float32) * 0.1

        inputs = (x,)                    # the module indexes inputs[0]
        out = pretrained_classifier_forward(inputs, wc, bc, wfc, bfc)
        out = jax.block_until_ready(out)

        ref = _reference_forward(inputs, wc, bc, wfc, bfc)
        assert out.shape == (1, B, num_classes), out.shape
        err = float(jnp.max(jnp.abs(out - ref)))
        assert jnp.allclose(out, ref, atol=atol, rtol=rtol), err
        return out

    k1, k2, k3, k4 = jax.random.split(key, 4)
    # Small channel count -> channels-first f32 VPU conv path (HW = 256).
    run_case(k1, B=2, C=4, H=16, W=16, F=32, num_classes=42, atol=1e-4, rtol=1e-4)
    # Larger channel count -> channels-first bf16 MXU path (no host transpose).
    run_case(k2, B=2, C=64, H=16, W=16, F=32, num_classes=42, atol=5e-3, rtol=5e-3)
    # Ragged spatial size (14x14 = 196, not a 128-multiple): masked last tile.
    run_case(k3, B=2, C=4, H=14, W=14, F=32, num_classes=10, atol=1e-4, rtol=1e-4)
    run_case(k4, B=2, C=64, H=14, W=14, F=32, num_classes=10, atol=5e-3, rtol=5e-3)

    print("KERNEL_OK")
</pallas_src>

<mosaic_0001>
module attributes {stable_mosaic.version = 11 : i64} {
  func.func @_conv_gap_fc_vpu_kernel(%arg0: i32, %arg1: i32, %arg2: memref<1x4x128xf32, #tpu.memory_space<vmem>>, %arg3: memref<4x32x1xf32, #tpu.memory_space<vmem>>, %arg4: memref<32x1xf32, #tpu.memory_space<vmem>>, %arg5: memref<32x128xf32, #tpu.memory_space<vmem>>, %arg6: memref<1x128xf32, #tpu.memory_space<vmem>>, %arg7: memref<1x1x128xf32, #tpu.memory_space<vmem>>, %arg8: memref<1x32xf32, #tpu.memory_space<vmem>>) attributes {dimension_semantics = [#tpu.dimension_semantics<parallel>, #tpu.dimension_semantics<arbitrary>], iteration_bounds = array<i64: 2, 2>, scalar_prefetch = 0 : i64, scratch_operands = 1 : i64, tpu.core_type = #tpu.core_type<tc>, window_params = [{transform_indices = @transform_0, window_bounds = array<i64: 1, 4, 128>}, {pipeline_mode = #tpu.pipeline_mode<synchronous>, transform_indices = @transform_1, window_bounds = array<i64: 4, 32, 1>}, {pipeline_mode = #tpu.pipeline_mode<synchronous>, transform_indices = @transform_2, window_bounds = array<i64: 32, 1>}, {pipeline_mode = #tpu.pipeline_mode<synchronous>, transform_indices = @transform_3, window_bounds = array<i64: 32, 128>}, {pipeline_mode = #tpu.pipeline_mode<synchronous>, transform_indices = @transform_4, window_bounds = array<i64: 1, 128>}, {transform_indices = @transform_5, window_bounds = array<i64: 1, 1, 128>}]} {
    %c0_i32 = arith.constant 0 : i32
    %0 = arith.cmpi eq, %arg1, %c0_i32 : i32
    %1 = arith.extui %0 : i1 to i32
    %c0_i32_0 = arith.constant 0 : i32
    %2 = arith.cmpi ne, %1, %c0_i32_0 : i32
    scf.if %2 {
      %cst_15 = arith.constant 0.000000e+00 : f32
      %59 = vector.broadcast %cst_15 : f32 to vector<1x32xf32>
      %c0_16 = arith.constant 0 : index
      %c0_17 = arith.constant 0 : index
      %60 = vector.load %arg8[%c0_16, %c0_17] : memref<1x32xf32, #tpu.memory_space<vmem>>, vector<1x32xf32>
      tpu.vector_store %arg8[%c0_16, %c0_17], %59 {strides = array<i32>} : memref<1x32xf32, #tpu.memory_space<vmem>>, vector<1x32xf32>,
    } else {
    }
    %c0 = arith.constant 0 : index
    %c0_1 = arith.constant 0 : index
    %c0_2 = arith.constant 0 : index
    %3 = vector.load %arg2[%c0, %c0_1, %c0_2] : memref<1x4x128xf32, #tpu.memory_space<vmem>>, vector<1x4x128xf32>
    %c0_3 = arith.constant 0 : index
    %c0_4 = arith.constant 0 : index
    %c0_5 = arith.constant 0 : index
    %4 = vector.load %arg3[%c0_3, %c0_4, %c0_5] : memref<4x32x1xf32, #tpu.memory_space<vmem>>, vector<4x32x1xf32>
    %cst = arith.constant 0.000000e+00 : f32
    %5 = vector.broadcast %cst : f32 to vector<1x32x128xf32>
    %6 = vector.extract_strided_slice %4 {offsets = [0, 0, 0], sizes = [1, 32, 1], strides = [1, 1, 1]} : vector<4x32x1xf32> to vector<1x32x1xf32>
    %7 = vector.shape_cast %6 : vector<1x32x1xf32> to vector<32x1xf32>
    %8 = vector.shape_cast %7 : vector<32x1xf32> to vector<1x32x1xf32>
    %9 = vector.extract_strided_slice %3 {offsets = [0, 0, 0], sizes = [1, 1, 128], strides = [1, 1, 1]} : vector<1x4x128xf32> to vector<1x1x128xf32>
    %10 = vector.shape_cast %9 : vector<1x1x128xf32> to vector<1x128xf32>
    %11 = vector.shape_cast %10 : vector<1x128xf32> to vector<1x1x128xf32>
    %12 = vector.broadcast %8 : vector<1x32x1xf32> to vector<1x32x128xf32>
    %13 = vector.broadcast %11 : vector<1x1x128xf32> to vector<1x32x128xf32>
    %14 = arith.mulf %12, %13 : vector<1x32x128xf32>
    %15 = arith.addf %5, %14 : vector<1x32x128xf32>
    %16 = vector.extract_strided_slice %4 {offsets = [1, 0, 0], sizes = [1, 32, 1], strides = [1, 1, 1]} : vector<4x32x1xf32> to vector<1x32x1xf32>
    %17 = vector.shape_cast %16 : vector<1x32x1xf32> to vector<32x1xf32>
    %18 = vector.shape_cast %17 : vector<32x1xf32> to vector<1x32x1xf32>
    %19 = vector.extract_strided_slice %3 {offsets = [0, 1, 0], sizes = [1, 1, 128], strides = [1, 1, 1]} : vector<1x4x128xf32> to vector<1x1x128xf32>
    %20 = vector.shape_cast %19 : vector<1x1x128xf32> to vector<1x128xf32>
    %21 = vector.shape_cast %20 : vector<1x128xf32> to vector<1x1x128xf32>
    %22 = vector.broadcast %18 : vector<1x32x1xf32> to vector<1x32x128xf32>
    %23 = vector.broadcast %21 : vector<1x1x128xf32> to vector<1x32x128xf32>
    %24 = arith.mulf %22, %23 : vector<1x32x128xf32>
    %25 = arith.addf %15, %24 : vector<1x32x128xf32>
    %26 = vector.extract_strided_slice %4 {offsets = [2, 0, 0], sizes = [1, 32, 1], strides = [1, 1, 1]} : vector<4x32x1xf32> to vector<1x32x1xf32>
    %27 = vector.shape_cast %26 : vector<1x32x1xf32> to vector<32x1xf32>
    %28 = vector.shape_cast %27 : vector<32x1xf32> to vector<1x32x1xf32>
    %29 = vector.extract_strided_slice %3 {offsets = [0, 2, 0], sizes = [1, 1, 128], strides = [1, 1, 1]} : vector<1x4x128xf32> to vector<1x1x128xf32>
    %30 = vector.shape_cast %29 : vector<1x1x128xf32> to vector<1x128xf32>
    %31 = vector.shape_cast %30 : vector<1x128xf32> to vector<1x1x128xf32>
    %32 = vector.broadcast %28 : vector<1x32x1xf32> to vector<1x32x128xf32>
    %33 = vector.broadcast %31 : vector<1x1x128xf32> to vector<1x32x128xf32>
    %34 = arith.mulf %32, %33 : vector<1x32x128xf32>
    %35 = arith.addf %25, %34 : vector<1x32x128xf32>
    %36 = vector.extract_strided_slice %4 {offsets = [3, 0, 0], sizes = [1, 32, 1], strides = [1, 1, 1]} : vector<4x32x1xf32> to vector<1x32x1xf32>
    %37 = vector.shape_cast %36 : vector<1x32x1xf32> to vector<32x1xf32>
    %38 = vector.shape_cast %37 : vector<32x1xf32> to vector<1x32x1xf32>
    %39 = vector.extract_strided_slice %3 {offsets = [0, 3, 0], sizes = [1, 1, 128], strides = [1, 1, 1]} : vector<1x4x128xf32> to vector<1x1x128xf32>
    %40 = vector.shape_cast %39 : vector<1x1x128xf32> to vector<1x128xf32>
    %41 = vector.shape_cast %40 : vector<1x128xf32> to vector<1x1x128xf32>
    %42 = vector.broadcast %38 : vector<1x32x1xf32> to vector<1x32x128xf32>
    %43 = vector.broadcast %41 : vector<1x1x128xf32> to vector<1x32x128xf32>
    %44 = arith.mulf %42, %43 : vector<1x32x128xf32>
    %45 = arith.addf %35, %44 : vector<1x32x128xf32>
    %c0_6 = arith.constant 0 : index
    %c0_7 = arith.constant 0 : index
    %46 = vector.load %arg4[%c0_6, %c0_7] : memref<32x1xf32, #tpu.memory_space<vmem>>, vector<32x1xf32>
    %47 = vector.shape_cast %46 : vector<32x1xf32> to vector<1x32x1xf32>
    %48 = vector.broadcast %47 : vector<1x32x1xf32> to vector<1x32x128xf32>
    %49 = arith.addf %45, %48 : vector<1x32x128xf32>
    %cst_8 = arith.constant 0.000000e+00 : f32
    %50 = vector.broadcast %cst_8 : f32 to vector<1x32x128xf32>
    %51 = arith.maximumf %49, %50 : vector<1x32x128xf32>
    %c0_9 = arith.constant 0 : index
    %c0_10 = arith.constant 0 : index
    %52 = vector.load %arg8[%c0_9, %c0_10] : memref<1x32xf32, #tpu.memory_space<vmem>>, vector<1x32xf32>
    %cst_11 = arith.constant dense<0.000000e+00> : vector<1x32xf32>
    %53 = vector.multi_reduction <add>, %51, %cst_11 [2] : vector<1x32x128xf32> to vector<1x32xf32>
    %54 = arith.addf %52, %53 : vector<1x32xf32>
    %c0_12 = arith.constant 0 : index
    %c0_13 = arith.constant 0 : index
    %55 = vector.load %arg8[%c0_12, %c0_13] : memref<1x32xf32, #tpu.memory_space<vmem>>, vector<1x32xf32>
    tpu.vector_store %arg8[%c0_12, %c0_13], %54 {strides = array<i32>} : memref<1x32xf32, #tpu.memory_space<vmem>>, vector<1x32xf32>,
    %c1_i32 = arith.constant 1 : i32
    %56 = arith.cmpi eq, %arg1, %c1_i32 : i32
    %57 = arith.extui %56 : i1 to i32
    %c0_i32_14 = arith.constant 0 : i32
    %58 = arith.cmpi ne, %57, %c0_i32_14 : i32
    scf.if %58 {
      %c0_15 = arith.constant 0 : index
      %c0_16 = arith.constant 0 : index
      %59 = vector.load %arg8[%c0_15, %c0_16] : memref<1x32xf32, #tpu.memory_space<vmem>>, vector<1x32xf32>
      %cst_17 = arith.constant 3.906250e-03 : f32
      %60 = vector.broadcast %cst_17 : f32 to vector<1x32xf32>
      %61 = arith.mulf %59, %60 : vector<1x32xf32>
      %c0_18 = arith.constant 0 : index
      %c0_19 = arith.constant 0 : index
      %62 = vector.load %arg5[%c0_18, %c0_19] : memref<32x128xf32, #tpu.memory_space<vmem>>, vector<32x128xf32>
      %cst_20 = arith.constant dense<0.000000e+00> : vector<1x128xf32>
      %63 = tpu.matmul %61, %62, %cst_20 {dimension_numbers = #tpu.dot_dimension_numbers<[1], [0], [0], [1], [0, 0, 1, 1], [], []>} : vector<1x32xf32>, vector<32x128xf32>, vector<1x128xf32> -> vector<1x128xf32>
      %c0_21 = arith.constant 0 : index
      %c0_22 = arith.constant 0 : index
      %64 = vector.load %arg6[%c0_21, %c0_22] : memref<1x128xf32, #tpu.memory_space<vmem>>, vector<1x128xf32>
      %65 = arith.addf %63, %64 : vector<1x128xf32>
      %66 = vector.shape_cast %65 : vector<1x128xf32> to vector<1x1x128xf32>
      %c0_23 = arith.constant 0 : index
      %c0_24 = arith.constant 0 : index
      %c0_25 = arith.constant 0 : index
      %67 = vector.load %arg7[%c0_23, %c0_24, %c0_25] : memref<1x1x128xf32, #tpu.memory_space<vmem>>, vector<1x1x128xf32>
      tpu.vector_store %arg7[%c0_23, %c0_24, %c0_25], %66 {strides = array<i32>} : memref<1x1x128xf32, #tpu.memory_space<vmem>>, vector<1x1x128xf32>,
    } else {
    }
    return
  }
  func.func @transform_0(%arg0: i32, %arg1: i32) -> (i32, i32, i32) {
    %c0_i32 = arith.constant 0 : i32
    %c0_i32_0 = arith.constant 0 : i32
    return %arg0, %c0_i32, %arg1 : i32, i32, i32
  }
  func.func @transform_1(%arg0: i32, %arg1: i32) -> (i32, i32, i32) {
    %c0_i32 = arith.constant 0 : i32
    %c0_i32_0 = arith.constant 0 : i32
    %c0_i32_1 = arith.constant 0 : i32
    %c0_i32_2 = arith.constant 0 : i32
    return %c0_i32, %c0_i32_0, %c0_i32_1 : i32, i32, i32
  }
  func.func @transform_2(%arg0: i32, %arg1: i32) -> (i32, i32) {
    %c0_i32 = arith.constant 0 : i32
    %c0_i32_0 = arith.constant 0 : i32
    %c0_i32_1 = arith.constant 0 : i32
    return %c0_i32, %c0_i32_0 : i32, i32
  }
  func.func @transform_3(%arg0: i32, %arg1: i32) -> (i32, i32) {
    %c0_i32 = arith.constant 0 : i32
    %c0_i32_0 = arith.constant 0 : i32
    %c0_i32_1 = arith.constant 0 : i32
    return %c0_i32, %c0_i32_0 : i32, i32
  }
  func.func @transform_4(%arg0: i32, %arg1: i32) -> (i32, i32) {
    %c0_i32 = arith.constant 0 : i32
    %c0_i32_0 = arith.constant 0 : i32
    %c0_i32_1 = arith.constant 0 : i32
    return %c0_i32, %c0_i32_0 : i32, i32
  }
  func.func @transform_5(%arg0: i32, %arg1: i32) -> (i32, i32, i32) {
    %c0_i32 = arith.constant 0 : i32
    %c0_i32_0 = arith.constant 0 : i32
    %c0_i32_1 = arith.constant 0 : i32
    return %arg0, %c0_i32, %c0_i32_0 : i32, i32, i32
  }
}

</mosaic_0001>

<bundles_post_ra>
// kernel: tpu_custom_call.1
= control target key start
LH: loop header
LB: loop body
LE: loop exit
PB: predicated region body
PF: predicated region fallthrough
CT: control target
= control target key end

     0   :  { %10 = vsyncpa [#allocation4], 0  ;;  %s1553_s0 = inlined_call_operand.vmem [shape: f32[2,4,256], index: 0, kind: input, shape index: {}]   ;;  %s1554_s1 = inlined_call_operand.vmem [shape: f32[4,32,1], index: 1, kind: input, shape index: {}]   ;;  %s1555_s2 = inlined_call_operand.vmem [shape: f32[32,1], index: 2, kind: input, shape index: {}]   ;;  %s1556_s3 = inlined_call_operand.vmem [shape: f32[32,128], index: 3, kind: input, shape index: {}]   ;;  %s1557_s4 = inlined_call_operand.vmem [shape: f32[1,128], index: 4, kind: input, shape index: {}]   ;;  %s1558_s5 = inlined_call_operand.hbm [shape: f32[2,1,128], index: 5, kind: output, shape index: {}]  }
   0x1   :  { %12 = vsyncpa [#allocation4 + $0x1], 0  ;;  %s1240_s18 = smov 0   ;;  %s1242_s19 = smov 0  }
   0x2   :  { %s1244_s20 = smov 0   ;;  %s1246_s21 = smov 0  }
   0x3   :  { %s1248_s22 = smov 0   ;;  %s1250_s23 = smov 0  }
   0x4   :  { %s1252_s24 = smov 0   ;;  %s1254_s25 = smov 0  }
   0x5 LB: > { %s993_s26 = sadd.s32 4294967295, %s1201_s25   ;;  %s994_s27 = sadd.s32 4294967294, %s1201_s25   ;;  %s1201_s25 = sphi %s1254_s25, %s18_s25   ;;  %s1197_s24 = sphi %s1252_s24, %s1569_s24   ;;  %s1193_s23 = sphi %s1250_s23, %s1568_s23   ;;  %s1189_s22 = sphi %s1248_s22, %s1567_s22   ;;  %s1185_s21 = sphi %s1246_s21, %s1566_s21   ;;  %s1181_s20 = sphi %s1244_s20, %s1565_s20   ;;  %s1177_s19 = sphi %s1242_s19, %s1564_s19   ;;  %s1173_s18 = sphi %s1240_s18, %s1563_s18  }
   0x6   : > { %s27_s28 = sadd.s32 1, %s1193_s23  ;;  %s30_s29 = sadd.s32 1, %s1197_s24 }
   0x7   : > { %p28_p0 = scmp.ge.s32.totalorder %s27_s28, 2  ;;  %p159_p1 = scmp.ne.s32.totalorder %s1181_s20, %s1177_s19 }
   0x8   : > { %p160_p2 = scmp.eq.s32.totalorder %s993_s26, 3  ;;  %p165_p4 = scmp.ne.s32.totalorder %s1177_s19, %s1173_s18 }
   0x9   : > { %s1571_s28 = smov (%p28_p0, %s27_s28), 0  ;;  %s1573_s29 = smov (!%p28_p0, %s30_s29), %s1197_s24 }
   0xa   : > { %p1289_p3 = por %p160_p2, %p159_p1  ;;  %p32_p5 = scmp.ge.s32.totalorder %s1573_s29, 2 }
   0xb   : > { %p166_p6 = scmp.eq.s32.totalorder %s994_s27, 3  ;;  %p997_p7 = scmp.ge.s32.totalorder %s1201_s25, 1 }
   0xc   : > { %p207_p8 = scmp.lt.s32.totalorder %s1201_s25, 5  ;;  %s1575_s29 = smov (%p32_p5, %s1573_s29), 0 }
   0xd   : > { %p1299_p9 = por %p166_p6, %p165_p4  ;;  %s146_s7 = ssub.s32 %s1197_s24, %s1575_s29 }
   0xe   : > { %p208_p10 = pnand %p997_p7, %p207_p8  ;;  %s149_s8 = sadd.s32 1, %s1181_s20 }
   0xf   : > { %p147_p11 = scmp.eq.s32.totalorder %s146_s7, 0  ;;  %s1559_s10 = sand.u32 (!%p208_p10), 1, %s1177_s19  }
  0x10   : > { %211 = sbr.rel (%p208_p10) target bundleno = 755 (0x2f3), region = 40  ;;  %p237_p12 = scmp.lt.s32.totalorder (!%p208_p10), %s1189_s22, 1 }
  0x11   : > { %s1307_s9 = scalar_select %p147_p11, %s1181_s20, %s149_s8  }
  0x12   : > { %p239_p13 = scmp.lt.s32.totalorder (!%p208_p10), %s1185_s21, 1  ;;  %s1321_s27 = scalar_lea.vmem (!%p208_p10), [#allocation3], %s1559_s10 }
  0x13   : > { %p1000_p0 = scmp.ne.s32.totalorder (!%p208_p10), %s1185_s21, 0 }
  0x17   : > { %s238_s11 = scalar_select %p237_p12, %s1189_s22, 1 }
  0x18   : > { %s240_s12 = scalar_select %p239_p13, %s1185_s21, 1 }
  0x19   : > { %s998_s13 = sshll.u32 %s238_s11, 1  ;;  %248 = sbr.rel (%p1000_p0) target bundleno = 32 (0x20), region = 44  ;;  %vm249_vm0 = vcmask (!%p1000_p0), 253952   ;;  %v1203_v0 = vmov (!%p1000_p0), 0.0  }
  0x1a   : > { %s242_s14 = sadd.s32 %s998_s13, %s240_s12  ;;  %250 = vst.msk [vmem:[#allocation2] sm:$0x1] (!%p1000_p0), %vm249_vm0, %v1203_v0 }
  0x1b   : > { %s999_s15 = sshll.u32 %s242_s14, 2 }
  0x1c   : > { %s1317_s26 = scalar_lea.vmem %s1553_s0, %s999_s15 }
  0x20 PF: > { %v256_v1 = vld [vmem:[%s1554_s1 + $0x20] sm:$0xff]  ;;  %v1204_v3 = vmov 0   ;;  %v257_v4 = vld [vmem:[%s1554_s1 + $0x28] sm:$0xff]  ;;  %v258_v6 = vld [vmem:[%s1554_s1 + $0x30] sm:$0xff]  ;;  %v288_v26 = vlaneseq  ;;  %vm788_vm1 = vcmask 130112   ;;  %vm795_vm2 = vcmask 195712  }
  0x21   : > { %v252_v2 = vld [vmem:[%s1554_s1] sm:$0xff]  ;;  %1106 = vset.pattern.permute.xlu1 %v1204_v3  ;;  %1105 = vset.pattern.permute.xlu0 %v1204_v3  ;;  %v253_v5 = vld [vmem:[%s1554_s1 + $0x8] sm:$0xff]  ;;  %v254_v7 = vld [vmem:[%s1554_s1 + $0x10] sm:$0xff]  ;;  %vm802_vm3 = vcmask 261312   ;;  %vm820_vm4 = vcmask 253952   ;;  %p1001_p1 = scmp.ne.s32.totalorder %s1185_s21, 1 }
  0x22   : > { %302 = vperm.xlu1 %1106, %v256_v1   ;;  %270 = vperm.xlu0 %1105, %v252_v2   ;;  %v259_v8 = vld [vmem:[%s1554_s1 + $0x38] sm:$0xff]  ;;  %v261_v10 = vld [vmem:[%s1554_s1 + $0x48] sm:$0xff]  ;;  %v260_v11 = vld [vmem:[%s1554_s1 + $0x40] sm:$0xff]  ;;  %v1385_v29 = vshrl.u32 %v288_v26, 7  ;;  %vm1207_vm5 = vmmov (!%p1001_p1), 0   ;;  %vm833_vm6 = vcmask (!%p1001_p1), 261120  }
  0x23   : > { %v255_v9 = vld [vmem:[%s1554_s1 + $0x18] sm:$0xff]  ;;  %v262_v13 = vld [vmem:[%s1554_s1 + $0x50] sm:$0xff]  ;;  %v265_v14 = vld [vmem:[%s1554_s1 + $0x68] sm:$0xff] }
  0x24   : > { %v263_v12 = vld [vmem:[%s1554_s1 + $0x58] sm:$0xff]  ;;  %v264_v15 = vld [vmem:[%s1554_s1 + $0x60] sm:$0xff]  ;;  %v266_v17 = vld [vmem:[%s1554_s1 + $0x70] sm:$0xff]  ;;  %v1388_v32 = vsub.s32 1, %v1385_v29  ;;  %v1391_v33 = vsub.s32 0, %v1385_v29  ;;  %v1395_v37 = vsub.s32 2, %v1385_v29 }
  0x25   : > { %v267_v16 = vld [vmem:[%s1554_s1 + $0x78] sm:$0xff]  ;;  %v397_v18 = vld [vmem:[%s1555_s2 + $0x8] sm:$0xff]  ;;  %v396_v19 = vld [vmem:[%s1555_s2] sm:$0xff]  ;;  %v1398_v38 = vsub.s32 3, %v1385_v29 }
  0x26   : > { %307 = vperm.xlu1 %1106, %v257_v4   ;;  %275 = vperm.xlu0 %1105, %v253_v5   ;;  %v399_v20 = vld [vmem:[%s1555_s2 + $0x18] sm:$0xff]  ;;  %v398_v21 = vld [vmem:[%s1555_s2 + $0x10] sm:$0xff]  ;;  %v251_v34 = vld [vmem:[%s1317_s26] sm:$0xf] }
  0x27   : > { %v323_v39 = vrot.slane %v251_v34, %v1388_v32  ;;  %v291_v40 = vrot.slane %v251_v34, %v1391_v33  ;;  %v355_v43 = vrot.slane %v251_v34, %v1395_v37  ;;  %v387_v44 = vrot.slane %v251_v34, %v1398_v38 }
  0x28   : > { %v1411_v34 = vsub.s32 6, %v1385_v29 }
  0x2a   : > { %312 = vperm.xlu1 %1106, %v258_v6   ;;  %280 = vperm.xlu0 %1105, %v254_v7  }
  0x2e   : > { %317 = vperm.xlu1 %1106, %v259_v8   ;;  %285 = vperm.xlu0 %1105, %v255_v9  }
  0x32   : > { %339 = vperm.xlu1 %1106, %v261_v10   ;;  %334 = vperm.xlu0 %1105, %v260_v11  }
  0x36   : > { %349 = vperm.xlu1 %1106, %v263_v12   ;;  %344 = vperm.xlu0 %1105, %v262_v13  }
  0x3a   : > { %371 = vperm.xlu1 %1106, %v265_v14   ;;  %366 = vperm.xlu0 %1105, %v264_v15  }
  0x3e   : > { %381 = vperm.xlu1 %1106, %v267_v16   ;;  %376 = vperm.xlu0 %1105, %v266_v17  }
  0x42   : > { %407 = vperm.xlu1 %1106, %v397_v18   ;;  %402 = vperm.xlu0 %1105, %v396_v19  }
  0x46   : > { %417 = vperm.xlu1 %1106, %v399_v20   ;;  %412 = vperm.xlu0 %1105, %v398_v21  }
  0xa1   : > { %v303_v22 = vpop.permute.xlu1 %302  ;;  %v271_v23 = vpop.permute.xlu0 %270 }
  0xa2   : > { %v324_v45 = vmul.f32 %v323_v39, %v303_v22  ;;  %v292_v46 = vmul.f32 %v291_v40, %v271_v23 }
  0xa4   : > { %v328_v55 = vadd.f32 %v324_v45, %v292_v46 }
  0xa5   : > { %v308_v24 = vpop.permute.xlu1 %307  ;;  %v276_v25 = vpop.permute.xlu0 %275 }
  0xa6   : > { %v325_v47 = vmul.f32 %v323_v39, %v308_v24  ;;  %v293_v48 = vmul.f32 %v291_v40, %v276_v25  ;;  %v1205_v25 = vmov 1966171168  }
  0xa8   : > { %v329_v56 = vadd.f32 %v325_v47, %v293_v48 }
  0xa9   : > { %v313_v27 = vpop.permute.xlu1 %312  ;;  %v281_v28 = vpop.permute.xlu0 %280 }
  0xaa   : > { %v326_v53 = vmul.f32 %v323_v39, %v313_v27  ;;  %v294_v54 = vmul.f32 %v291_v40, %v281_v28  ;;  %v574_v27 = vunpack.c.l.s4 %v1205_v25 }
  0xac   : > { %v330_v2 = vadd.f32 %v326_v53, %v294_v54  ;;  %v575_v28 = vunpack.c.0.s8 %v574_v27 }
  0xad   : > { %v318_v30 = vpop.permute.xlu1 %317  ;;  %v286_v31 = vpop.permute.xlu0 %285 }
  0xae   : > { %v327_v59 = vmul.f32 %v323_v39, %v318_v30  ;;  %v295_v60 = vmul.f32 %v291_v40, %v286_v31  ;;  %v1405_v30 = vsub.s32 4, %v1385_v29  ;;  %v1408_v31 = vsub.s32 5, %v1385_v29 }
  0xaf   : > { %v1417_v40 = vsub.s32 %v575_v28, %v1385_v29 }
  0xb0   : > { %v331_v7 = vadd.f32 %v327_v59, %v295_v60 }
  0xb1   : > { %v340_v35 = vpop.permute.xlu1 %339  ;;  %v335_v36 = vpop.permute.xlu0 %334 }
  0xb2   : > { %v357_v51 = vmul.f32 %v355_v43, %v340_v35  ;;  %v356_v52 = vmul.f32 %v355_v43, %v335_v36  ;;  %v1414_v35 = vsub.s32 7, %v1385_v29 }
  0xb4   : > { %v361_v63 = vadd.f32 %v357_v51, %v329_v56  ;;  %v360_v0 = vadd.f32 %v356_v52, %v328_v55 }
  0xb5   : > { %v350_v41 = vpop.permute.xlu1 %349  ;;  %v345_v42 = vpop.permute.xlu0 %344 }
  0xb6   : > { %v358_v1 = vmul.f32 %v355_v43, %v345_v42  ;;  %v359_v3 = vmul.f32 %v355_v43, %v350_v41 }
  0xb8   : > { %v362_v10 = vadd.f32 %v358_v1, %v330_v2  ;;  %v363_v14 = vadd.f32 %v359_v3, %v331_v7 }
  0xb9   : > { %v372_v49 = vpop.permute.xlu1 %371  ;;  %v367_v50 = vpop.permute.xlu0 %366 }
  0xba   : > { %v389_v57 = vmul.f32 %v387_v44, %v372_v49  ;;  %v388_v58 = vmul.f32 %v387_v44, %v367_v50 }
  0xbc   : > { %v393_v5 = vadd.f32 %v389_v57, %v361_v63  ;;  %v392_v6 = vadd.f32 %v388_v58, %v360_v0 }
  0xbd   : > { %v382_v61 = vpop.permute.xlu1 %381  ;;  %v377_v62 = vpop.permute.xlu0 %376 }
  0xbe   : > { %v390_v4 = vmul.f32 %v387_v44, %v377_v62  ;;  %v391_v11 = vmul.f32 %v387_v44, %v382_v61 }
  0xc0   : > { %v394_v17 = vadd.f32 %v390_v4, %v362_v10  ;;  %v395_v20 = vadd.f32 %v391_v11, %v363_v14 }
  0xc1   : > { %v408_v8 = vpop.permute.xlu1 %407  ;;  %v403_v9 = vpop.permute.xlu0 %402 }
  0xc2   : > { %v421_v12 = vadd.f32 %v408_v8, %v393_v5  ;;  %v420_v13 = vadd.f32 %v403_v9, %v392_v6 }
  0xc4   : > { %v425_v15 = vmax.f32 %v421_v12, 0.0  ;;  %v424_v16 = vmax.f32 %v420_v13, 0.0 }
  0xc5   : > { %v418_v18 = vpop.permute.xlu1 %417  ;;  %v413_v19 = vpop.permute.xlu0 %412 }
  0xc6   : > { %v422_v21 = vadd.f32 %v413_v19, %v394_v17  ;;  %431 = vadd.xlane.f32.xlu1 %v425_v15  ;;  %429 = vadd.xlane.f32.xlu0 %v424_v16  ;;  %v423_v22 = vadd.f32 %v418_v18, %v395_v20 }
  0xc8   : > { %v426_v23 = vmax.f32 %v422_v21, 0.0  ;;  %v427_v24 = vmax.f32 %v423_v22, 0.0 }
  0xca   : > { %433 = vadd.xlane.f32.xlu0 %v426_v23 }
  0xce   : > { %435 = vadd.xlane.f32.xlu0 %v427_v24 }
 0x153   : > { %v432_v36 = vpop.xlane.xlu1 %431  ;;  %v430_v39 = vpop.xlane.xlu0 %429 }
 0x154   : > { %v476_v41 = vrot.slane %v432_v36, %v1391_v33  ;;  %v480_v42 = vrot.slane %v432_v36, %v1388_v32  ;;  %v484_v43 = vrot.slane %v432_v36, %v1395_v37  ;;  %v488_v44 = vrot.slane %v432_v36, %v1398_v38 }
 0x155   : > { %v492_v45 = vrot.slane %v432_v36, %v1405_v30  ;;  %v496_v46 = vrot.slane %v432_v36, %v1408_v31  ;;  %v500_v47 = vrot.slane %v432_v36, %v1411_v34  ;;  %v504_v48 = vrot.slane %v432_v36, %v1414_v35 }
 0x156   : > { %v618_v49 = vcombine.low %v476_v41, %v480_v42  ;;  %v619_v50 = vcombine.low %v484_v43, %v488_v44  ;;  %v444_v51 = vrot.slane %v430_v39, %v1391_v33  ;;  %v448_v52 = vrot.slane %v430_v39, %v1388_v32 }
 0x157   : > { %v434_v53 = vpop.xlane.xlu0 %433  ;;  %v620_v54 = vcombine.low %v492_v45, %v496_v46  ;;  %v621_v55 = vcombine.low %v500_v47, %v504_v48  ;;  %v452_v56 = vrot.slane %v430_v39, %v1395_v37  ;;  %v456_v57 = vrot.slane %v430_v39, %v1398_v38 }
 0x158   : > { %v628_v58 = vrot.slane %v618_v49, %v1417_v40  ;;  %v635_v59 = vrot.slane %v619_v50, %v1417_v40  ;;  %v460_v60 = vrot.slane %v430_v39, %v1405_v30  ;;  %v464_v61 = vrot.slane %v430_v39, %v1408_v31 }
 0x159   : > { %v642_v62 = vrot.slane %v620_v54, %v1417_v40  ;;  %v649_v63 = vrot.slane %v621_v55, %v1417_v40  ;;  %v468_v0 = vrot.slane %v430_v39, %v1411_v34  ;;  %v472_v1 = vrot.slane %v430_v39, %v1414_v35 }
 0x15a   : > { %v650_v2 = vcombine.low %v628_v58, %v635_v59  ;;  %v569_v3 = vcombine.low %v444_v51, %v448_v52  ;;  %v570_v4 = vcombine.low %v452_v56, %v456_v57  ;;  %v571_v5 = vcombine.low %v460_v60, %v464_v61 }
 0x15b   : > { %v651_v6 = vcombine.low %v642_v62, %v649_v63  ;;  %v572_v7 = vcombine.low %v468_v0, %v472_v1  ;;  %v508_v8 = vrot.slane %v434_v53, %v1391_v33  ;;  %v512_v9 = vrot.slane %v434_v53, %v1388_v32  ;;  %v436_v14 = vpop.xlane.xlu0 %435 }
 0x15c   : > { %v658_v10 = vrot.slane %v650_v2, %v1417_v40  ;;  %v579_v11 = vrot.slane %v569_v3, %v1417_v40  ;;  %v586_v12 = vrot.slane %v570_v4, %v1417_v40  ;;  %v593_v13 = vrot.slane %v571_v5, %v1417_v40 }
 0x15d   : > { %v665_v15 = vrot.slane %v651_v6, %v1417_v40  ;;  %v600_v16 = vrot.slane %v572_v7, %v1417_v40  ;;  %v516_v17 = vrot.slane %v434_v53, %v1395_v37  ;;  %v520_v18 = vrot.slane %v434_v53, %v1398_v38 }
 0x15e   : > { %v601_v19 = vcombine.low %v579_v11, %v586_v12  ;;  %v524_v20 = vrot.slane %v434_v53, %v1405_v30  ;;  %v528_v21 = vrot.slane %v434_v53, %v1408_v31  ;;  %v532_v22 = vrot.slane %v434_v53, %v1411_v34 }
 0x15f   : > { %v666_v23 = vcombine.low %v658_v10, %v665_v15  ;;  %v602_v24 = vcombine.low %v593_v13, %v600_v16  ;;  %v536_v25 = vrot.slane %v434_v53, %v1414_v35  ;;  %v667_v27 = vcombine.low %v508_v8, %v512_v9 }
 0x160   : > { %v609_v28 = vrot.slane %v601_v19, %v1417_v40  ;;  %v668_v36 = vcombine.low %v516_v17, %v520_v18  ;;  %v669_v39 = vcombine.low %v524_v20, %v528_v21  ;;  %v540_v41 = vrot.slane %v436_v14, %v1391_v33  ;;  %v428_v21 = vld [vmem:[#allocation2] sm:$0x1] }
 0x161   : > { %769 = vperm.xlu0 %1105, %v666_v23   ;;  %v616_v42 = vrot.slane %v602_v24, %v1417_v40  ;;  %v670_v43 = vcombine.low %v532_v22, %v536_v25  ;;  %v677_v44 = vrot.slane %v667_v27, %v1417_v40  ;;  %v544_v45 = vrot.slane %v436_v14, %v1388_v32  ;;  %v829_v24 = vld [vmem:[%s1556_s3 + $0x8] sm:$0xff] (!%p1001_p1)  ;;  %v830_v25 = vld [vmem:[%s1556_s3 + $0x10] sm:$0xff] (!%p1001_p1) }
 0x162   : > { %v684_v46 = vrot.slane %v668_v36, %v1417_v40  ;;  %v691_v47 = vrot.slane %v669_v39, %v1417_v40  ;;  %v548_v48 = vrot.slane %v436_v14, %v1395_v37  ;;  %v552_v49 = vrot.slane %v436_v14, %v1398_v38 }
 0x163   : > { %v617_v50 = vcombine.low %v609_v28, %v616_v42  ;;  %v698_v51 = vrot.slane %v670_v43, %v1417_v40  ;;  %v556_v33 = vrot.slane %v436_v14, %v1405_v30  ;;  %v560_v52 = vrot.slane %v436_v14, %v1408_v31  ;;  %v831_v28 = vld [vmem:[%s1556_s3 + $0x18] sm:$0xff] (!%p1001_p1)  ;;  %v832_v43 = vld [vmem:[%s1557_s4] sm:$0x1] (!%p1001_p1) }
 0x164   : > { %v699_v53 = vcombine.low %v677_v44, %v684_v46  ;;  %v564_v54 = vrot.slane %v436_v14, %v1411_v34  ;;  %v568_v32 = vrot.slane %v436_v14, %v1414_v35  ;;  %v716_v55 = vcombine.low %v540_v41, %v544_v45 }
 0x165   : > { %766 = vperm.xlu1 %1106, %v617_v50   ;;  %v700_v56 = vcombine.low %v691_v47, %v698_v51  ;;  %v717_v57 = vcombine.low %v548_v48, %v552_v49  ;;  %v718_v58 = vcombine.low %v556_v33, %v560_v52  ;;  %v778_v2 = vand.u32 127, %v288_v26 }
 0x166   : > { %v707_v37 = vrot.slane %v699_v53, %v1417_v40  ;;  %v719_v38 = vcombine.low %v564_v54, %v568_v32  ;;  %v726_v59 = vrot.slane %v716_v55, %v1417_v40  ;;  %v1206_v27 = vmov (!%p1001_p1), 0.0|0.0  }
 0x167   : > { %v714_v60 = vrot.slane %v700_v56, %v1417_v40  ;;  %v733_v30 = vrot.slane %v717_v57, %v1417_v40  ;;  %v740_v31 = vrot.slane %v718_v58, %v1417_v40  ;;  %v783_v4 = vadd.s32 4294967288, %v778_v2  ;;  %1022 = vmatprep.subr.bf16.mxu0 (!%p1001_p1), %v1206_v27 }
 0x168   : > { %v747_v34 = vrot.slane %v719_v38, %v1417_v40  ;;  %v790_v5 = vadd.s32 4294967280, %v778_v2  ;;  %v781_v6 = vsub.s32 %v778_v2, %v1385_v29  ;;  %v797_v8 = vadd.s32 4294967272, %v778_v2 }
 0x169   : > { %v715_v61 = vcombine.low %v707_v37, %v714_v60  ;;  %v748_v35 = vcombine.low %v726_v59, %v733_v30  ;;  %v786_v7 = vsub.s32 %v783_v4, %v1385_v29  ;;  %v1208_v36 = vmov (!%p1001_p1), 0.0  }
 0x16a   : > { %v749_v62 = vcombine.low %v740_v31, %v747_v34  ;;  %v793_v10 = vsub.s32 %v790_v5, %v1385_v29  ;;  %v800_v14 = vsub.s32 %v797_v8, %v1385_v29  ;;  %v828_v29 = vld [vmem:[%s1556_s3] sm:$0xff] (!%p1001_p1)  ;;  %1019 = vmatprep.mubr.msk.f32.mxu0 (!%p1001_p1), %vm1207_vm5, %v1208_v36  ;;  %v1026_v39 = vpack.c.bf16 (!%p1001_p1), %v831_v28, %v830_v25 }
 0x16b   : > { %772 = vperm.xlu1 %1106, %v715_v61   ;;  %v756_v63 = vrot.slane %v748_v35, %v1417_v40 }
 0x16c   : > { %v763_v0 = vrot.slane %v749_v62, %v1417_v40 }
 0x16e   : > { %v764_v1 = vcombine.low %v756_v63, %v763_v0 }
 0x170   : > { %775 = vperm.xlu1 %1106, %v764_v1  }
 0x1e0   : > { %v770_v9 = vpop.permute.xlu0 %769 }
 0x1e1   : > { %v787_v13 = vrot.slane %v770_v9, %v786_v7 }
 0x1e4   : > { %v767_v3 = vpop.permute.xlu1 %766 }
 0x1e5   : > { %v782_v12 = vrot.slane %v767_v3, %v781_v6 }
 0x1e7   : > { %v789_v16 = vsel %vm788_vm1, %v787_v13, %v782_v12 }
 0x1ea   : > { %v773_v11 = vpop.permute.xlu1 %772 }
 0x1eb   : > { %v794_v15 = vrot.slane %v773_v11, %v793_v10 }
 0x1ed   : > { %v796_v18 = vsel %vm795_vm2, %v794_v15, %v789_v16 }
 0x1ef   : > { %v776_v26 = vpop.permute.xlu1 %775 }
 0x1f0   : > { %v801_v17 = vrot.slane %v776_v26, %v800_v14 }
 0x1f2   : > { %v803_v19 = vsel %vm802_vm3, %v801_v17, %v796_v18 }
 0x1f3   : > { %v810_v20 = vrot.slane %v803_v19, %v1417_v40  ;;  %825 = sbr.rel (%p1001_p1) target bundleno = 730 (0x2da), region = 48 }
 0x1f5   : > { %v817_v22 = vrot.slane %v810_v20, %v1417_v40  ;;  %v1023_v40 = vpack.c.bf16 (!%p1001_p1), %v829_v24, %v828_v29 }
 0x1f7   : > { %v819_v23 = vadd.f32 %v817_v22, %v428_v21  ;;  %1024 = vmatpush3.bf16.msra.mxu0 (!%p1001_p1), %v1023_v40 }
 0x1f8   : > { %1025 = vmatprep.subr.bf16.mxu0 (!%p1001_p1), %v1206_v27 }
 0x1f9   : > { %821 = vst.msk [vmem:[#allocation2] sm:$0x1] %vm820_vm4, %v819_v23 }
 0x1fb   : > { %1027 = vmatpush3.bf16.msra.mxu0 %v1026_v39 }
 0x200   : > { %v826_v41 = vld [vmem:[#allocation2] sm:$0x1] }
 0x201   : > { %v827_v42 = vmul.f32 0.00390625, %v826_v41 }
 0x203   : > { %1020 = vmatmul.mubr.msk.f32.vlgmr.msra.gmra.mrb[0].mxu0 %vm833_vm6, %v827_v42 }
 0x2d6   : > { %v903_v44 = vpop.f32.mrb[0].mxu0 }
 0x2d7   : > { %v904_v45 = vadd.f32 %v903_v44, %v832_v43  ;;  %v1021_v46 = vpop.f32.mrb[1].mxu0 }
 0x2d9   : > { %907 = vst [vmem:[%s1321_s27] sm:$0x1] %v904_v45 }
 0x2da PF: > { %s1003_s17 = sshll.u32 %s1189_s22, 4  ;;  %s921_s11 = sshll.u32 %s1321_s27, 4  ;;  %s922_s11 = int_to_ptr.vmem [resolvable:$true] %s921_s11 }
 0x2db   : > { %s1503_s8 = scalar_lea.hbm %s1558_s5, %s1003_s17  ;;  %s1562_s10 = sand.u32 1, %s1177_s19  }
 0x2dc   : > { %s909_s12 = scalar_lea.sflag [#allocation4], %s1562_s10  ;;  %s1107_s13 = scalar_lea.vmem %s922_s11, 16 }
 0x2dd   : > { %p1108_p2 = scmp.ne.s32.totalorder %s922_s11, %s1107_s13  ;;  %s1209_s14 = smov [#allocation3]  }
 0x2de   : > { %s1111_s15 = sshll.u32 %s1209_s14, 4  ;;  %s1112_s15 = int_to_ptr.vmem [resolvable:$false] %s1111_s15 }
 0x2df   : > { %p1109_p4 = pnand %p1108_p2, %p1289_p3  ;;  %s1113_s21 = scalar_lea.vmem %s1112_s15, 32 }
 0x2e0   : > { %p1114_p6 = scmp.lt.s32.totalorder %s922_s11, %s1112_s15  ;;  %p1115_p7 = scmp.lt.s32.totalorder %s1113_s21, %s1107_s13 }
 0x2e1   : > { %p1110_p5 = pneg %p1109_p4 }
 0x2e2   : > { %p1116_p8 = por %p1115_p7, %p1114_p6 }
 0x2e4   : > { %p1117_p10 = pnand %p1116_p8, %p1110_p5 }
 0x2e6   : > { %1120 = shalt.err (!%p1117_p10)
}
 0x2e7   : > { %s1121_s22 = scalar_lea.hbm %s1503_s8, 16  ;;  %s1125_s17 = scalar_lea.hbm %s1558_s5, 32 }
 0x2e8   : > { %p1122_p11 = scmp.ne.s32.totalorder %s1503_s8, %s1121_s22  ;;  %p1126_p0 = scmp.lt.u32.totalorder %s1503_s8, %s1558_s5 }
 0x2e9   : > { %p1127_p1 = scmp.lt.u32.totalorder %s1125_s17, %s1121_s22  ;;  %p1129_p4 = scmp.lt.u32.totalorder %s1121_s22, %s1503_s8 }
 0x2ea   : > { %p1123_p12 = pnand %p1122_p11, %p1289_p3 }
 0x2eb   : > { %p1128_p2 = por %p1127_p1, %p1126_p0 }
 0x2ec   : > { %p1124_p13 = pneg %p1123_p12 }
 0x2ed   : > { %p1130_p5 = por %p1129_p4, %p1128_p2 }
 0x2ef   : > { %p1131_p6 = pnand %p1130_p5, %p1124_p13 }
 0x2f1   : > { %1134 = shalt.err (!%p1131_p6)
}
 0x2f2   : > { %1028 = dma.vmem_to_hbm [thread:$0]  (%p1289_p3), %s922_s11, 16, %s1503_s8, %s909_s12  }
 0x2f3 PF: > { %p1034_p7 = scmp.ge.s32.totalorder %s1201_s25, 2  ;;  %s933_s10 = sand.u32 1, %s1173_s18  }
 0x2f4   : > { %s934_s13 = scalar_lea.sflag [#allocation4], %s933_s10 }
 0x2f5   : > { %p1031_p8 = pnand %p1034_p7, %p1299_p9 }
 0x2f7   : > { %1168 = dma.done.wait (!%p1031_p8), %s934_s13, 16  }
 0x2f8   : > { %1170 = vsyncadd (!%p1031_p8), %s934_s13, 4294967280  ;;  %s18_s25 = sadd.s32 1, %s1201_s25   ;;  %s1563_s18 = smov %s1177_s19 }
 0x2f9   : > { %p15_p10 = scmp.ge.s32.totalorder %s18_s25, 6   ;;  %s1564_s19 = smov %s1181_s20 }
 0x2fa   : > { %s1565_s20 = smov %s1307_s9  ;;  %s1566_s21 = smov %s1193_s23 }
 0x2fb   : > { %s1567_s22 = smov %s1197_s24  ;;  %s1568_s23 = smov %s1571_s28 }
 0x2fc   : > { %s1569_s24 = smov %s1575_s29  ;;  %17 = sbr.rel (!%p15_p10) target bundleno = 5 (0x5), region = 83 }
 0x303   :  { %938 = vsyncpa [#allocation4], 1 }
 0x304   :  { %940 = vsyncpa [#allocation4 + $0x1], 1 }

</bundles_post_ra>
